<compile_context>
chip_gen: v6e
topology: v6e:2x2x1
jax: 0.10.0
libtpu: 0.0.40
codegen_flags: <defaults>
</compile_context>

<pallas_src>
import jax
import jax.numpy as jnp
from jax import lax
from jax.experimental import pallas as pl
from jax.experimental.pallas import tpu as pltpu

EPS = 1e-12      # torch F.normalize default
D_PAD = 128      # lane-width padding for the hidden dimension


def _round_up(x, m):
    return -(-x // m) * m


def triplet_head_kernel(feat_ref, w1_ref, b1_ref, w2_ref, b2_ref, out_ref):
    d_out = out_ref.shape[-1]
    # fc1: cast features to bf16 in-kernel (no extra wrapper pass over HBM),
    # (TM, 768) bf16 @ (768, 128) bf16 -> f32 accum, + bias, ReLU.
    x = feat_ref[...].astype(jnp.bfloat16)
    h = jnp.dot(x, w1_ref[...], preferred_element_type=jnp.float32)
    h = jnp.maximum(h + b1_ref[...], 0.0)
    # fc2 in bf16 on the 128-lane padded weights (zero rows/cols contribute 0).
    logits = jnp.dot(h.astype(jnp.bfloat16), w2_ref[...],
                     preferred_element_type=jnp.float32) + b2_ref[...]
    # F.normalize(p=2, dim=1): x / max(||x||, eps) == x * rsqrt(max(||x||^2, eps^2)).
    # Padded columns are exactly zero, so the norm over 128 lanes == norm over d_out.
    sq = jnp.sum(logits * logits, axis=1, keepdims=True)
    inv = lax.rsqrt(jnp.maximum(sq, EPS * EPS))
    out_ref[...] = (logits * inv)[:, :d_out]


def prepare_head_params(w1, b1, w2, b2):
    """One-time weight prep (pad 64->128, cast matmul operands to bf16)."""
    d_in, d_hid = w1.shape
    d_out = w2.shape[-1]
    b1 = jnp.asarray(b1).reshape(1, d_hid)
    b2 = jnp.asarray(b2).reshape(1, d_out)
    w1p = jnp.zeros((d_in, D_PAD), jnp.bfloat16).at[:, :d_hid].set(
        w1.astype(jnp.bfloat16))
    b1p = jnp.zeros((1, D_PAD), jnp.float32).at[:, :d_hid].set(
        b1.astype(jnp.float32))
    w2p = jnp.zeros((D_PAD, D_PAD), jnp.bfloat16).at[:d_hid, :d_out].set(
        w2.astype(jnp.bfloat16))
    b2p = jnp.zeros((1, D_PAD), jnp.float32).at[:, :d_out].set(
        b2.astype(jnp.float32))
    return w1p, b1p, w2p, b2p, d_out


def triplet_head(features, params, *, tm=2048):
    """features: (B, 768) f32 (or bf16); params from prepare_head_params()."""
    w1p, b1p, w2p, b2p, d_out = params
    B, d_in = features.shape

    # Batch tiling: multiple of 8 sublanes; cap so the grid has >= ~4 steps
    # (>= 2 tiles per v7x TensorCore, and DMA/compute overlap everywhere).
    tm = max(8, min(tm, _round_up(pl.cdiv(B, 4), 8)))
    grid = (pl.cdiv(B, tm),)

    cost = pl.CostEstimate(
        flops=2 * B * (d_in * D_PAD + D_PAD * D_PAD),
        transcendentals=B,
        bytes_accessed=(features.size * features.dtype.itemsize
                        + w1p.size * 2 + w2p.size * 2
                        + b1p.size * 4 + b2p.size * 4
                        + B * d_out * 4),
    )

    invariant = dict(pipeline_mode=pl.Buffered(1))  # single-buffer resident weights

    return pl.pallas_call(
        triplet_head_kernel,
        out_shape=jax.ShapeDtypeStruct((B, d_out), jnp.float32),
        grid=grid,
        in_specs=[
            pl.BlockSpec((tm, d_in), lambda i: (i, 0)),                   # features
            pl.BlockSpec((d_in, D_PAD), lambda i: (0, 0), **invariant),   # w1 (resident)
            pl.BlockSpec((1, D_PAD), lambda i: (0, 0), **invariant),      # b1 (resident)
            pl.BlockSpec((D_PAD, D_PAD), lambda i: (0, 0), **invariant),  # w2 (resident)
            pl.BlockSpec((1, D_PAD), lambda i: (0, 0), **invariant),      # b2 (resident)
        ],
        out_specs=pl.BlockSpec((tm, d_out), lambda i: (i, 0)),
        compiler_params=pltpu.CompilerParams(
            dimension_semantics=("parallel",),
            vmem_limit_bytes=40 * 1024 * 1024),
        cost_estimate=cost,
    )(features, w1p, b1p, w2p, b2p)


def reference(features, w1, b1, w2, b2):
    h = jnp.maximum(features @ w1 + b1, 0.0)
    logits = h @ w2 + b2
    norm = jnp.sqrt(jnp.sum(logits * logits, axis=1, keepdims=True))
    return logits / jnp.maximum(norm, EPS)


if __name__ == "__main__":
    key = jax.random.PRNGKey(0)
    k_feat, k_w1, k_b1, k_w2, k_b2 = jax.random.split(key, 5)

    B, D_IN, D_HID, D_OUT = 16, 768, 64, 9

    # Deterministic synthetic "encoder features" and head parameters.
    features = jax.random.normal(k_feat, (B, D_IN), dtype=jnp.float32)
    w1 = jax.random.normal(k_w1, (D_IN, D_HID), dtype=jnp.float32) * 0.02
    b1 = jax.random.normal(k_b1, (1, D_HID), dtype=jnp.float32) * 0.01
    w2 = jax.random.normal(k_w2, (D_HID, D_OUT), dtype=jnp.float32) * 0.02
    b2 = jax.random.normal(k_b2, (1, D_OUT), dtype=jnp.float32) * 0.01

    params = prepare_head_params(w1, b1, w2, b2)   # one-time, outside the hot path
    ref = reference(features, w1, b1, w2, b2)

    # B=16 -> tm clamps to 8, multi-step grid.
    out = jax.block_until_ready(triplet_head(features, params))
    assert out.shape == (B, D_OUT)
    # bf16 fc1/fc2 operands with f32 accumulation -> loosened tolerance.
    assert jnp.allclose(out, ref, atol=4e-2, rtol=4e-2)
    # Rows are still unit-norm (normalization done in f32).
    assert jnp.allclose(jnp.linalg.norm(out, axis=1), 1.0, atol=1e-4)

    # Ragged batch (not a multiple of the tile) exercises the cdiv grid path.
    B2 = 13
    out2 = jax.block_until_ready(triplet_head(features[:B2], params))
    assert out2.shape == (B2, D_OUT)
    assert jnp.allclose(out2, ref[:B2], atol=4e-2, rtol=4e-2)

    print("KERNEL_OK")
</pallas_src>

<mosaic_0001>
module attributes {stable_mosaic.version = 11 : i64} {
  func.func @triplet_head_kernel(%arg0: i32, %arg1: memref<8x768xf32, #tpu.memory_space<vmem>>, %arg2: memref<768x128xbf16, #tpu.memory_space<vmem>>, %arg3: memref<1x128xf32, #tpu.memory_space<vmem>>, %arg4: memref<128x128xbf16, #tpu.memory_space<vmem>>, %arg5: memref<1x128xf32, #tpu.memory_space<vmem>>, %arg6: memref<8x9xf32, #tpu.memory_space<vmem>>) attributes {dimension_semantics = [#tpu.dimension_semantics<parallel>], iteration_bounds = array<i64: 2>, scalar_prefetch = 0 : i64, scratch_operands = 0 : i64, tpu.core_type = #tpu.core_type<tc>, window_params = [{transform_indices = @transform_0, window_bounds = array<i64: 8, 768>}, {pipeline_mode = #tpu.pipeline_mode<synchronous>, transform_indices = @transform_1, window_bounds = array<i64: 768, 128>}, {pipeline_mode = #tpu.pipeline_mode<synchronous>, transform_indices = @transform_2, window_bounds = array<i64: 1, 128>}, {pipeline_mode = #tpu.pipeline_mode<synchronous>, transform_indices = @transform_3, window_bounds = array<i64: 128, 128>}, {pipeline_mode = #tpu.pipeline_mode<synchronous>, transform_indices = @transform_4, window_bounds = array<i64: 1, 128>}, {transform_indices = @transform_5, window_bounds = array<i64: 8, 9>}]} {
    %c0 = arith.constant 0 : index
    %c0_0 = arith.constant 0 : index
    %0 = vector.load %arg1[%c0, %c0_0] : memref<8x768xf32, #tpu.memory_space<vmem>>, vector<8x768xf32>
    %1 = arith.truncf %0 : vector<8x768xf32> to vector<8x768xbf16>
    %c0_1 = arith.constant 0 : index
    %c0_2 = arith.constant 0 : index
    %2 = vector.load %arg2[%c0_1, %c0_2] : memref<768x128xbf16, #tpu.memory_space<vmem>>, vector<768x128xbf16>
    %cst = arith.constant dense<0.000000e+00> : vector<8x128xf32>
    %3 = tpu.matmul %1, %2, %cst {dimension_numbers = #tpu.dot_dimension_numbers<[1], [0], [0], [1], [0, 0, 1, 1], [], []>} : vector<8x768xbf16>, vector<768x128xbf16>, vector<8x128xf32> -> vector<8x128xf32>
    %c0_3 = arith.constant 0 : index
    %c0_4 = arith.constant 0 : index
    %4 = vector.load %arg3[%c0_3, %c0_4] : memref<1x128xf32, #tpu.memory_space<vmem>>, vector<1x128xf32>
    %5 = vector.broadcast %4 : vector<1x128xf32> to vector<8x128xf32>
    %6 = arith.addf %3, %5 : vector<8x128xf32>
    %cst_5 = arith.constant 0.000000e+00 : f32
    %7 = vector.broadcast %cst_5 : f32 to vector<8x128xf32>
    %8 = arith.maximumf %6, %7 : vector<8x128xf32>
    %9 = arith.truncf %8 : vector<8x128xf32> to vector<8x128xbf16>
    %c0_6 = arith.constant 0 : index
    %c0_7 = arith.constant 0 : index
    %10 = vector.load %arg4[%c0_6, %c0_7] : memref<128x128xbf16, #tpu.memory_space<vmem>>, vector<128x128xbf16>
    %cst_8 = arith.constant dense<0.000000e+00> : vector<8x128xf32>
    %11 = tpu.matmul %9, %10, %cst_8 {dimension_numbers = #tpu.dot_dimension_numbers<[1], [0], [0], [1], [0, 0, 1, 1], [], []>} : vector<8x128xbf16>, vector<128x128xbf16>, vector<8x128xf32> -> vector<8x128xf32>
    %c0_9 = arith.constant 0 : index
    %c0_10 = arith.constant 0 : index
    %12 = vector.load %arg5[%c0_9, %c0_10] : memref<1x128xf32, #tpu.memory_space<vmem>>, vector<1x128xf32>
    %13 = vector.broadcast %12 : vector<1x128xf32> to vector<8x128xf32>
    %14 = arith.addf %11, %13 : vector<8x128xf32>
    %15 = arith.mulf %14, %14 : vector<8x128xf32>
    %cst_11 = arith.constant dense<0.000000e+00> : vector<8xf32>
    %16 = vector.multi_reduction <add>, %15, %cst_11 [1] : vector<8x128xf32> to vector<8xf32>
    %17 = vector.shape_cast %16 : vector<8xf32> to vector<8x1xf32>
    %cst_12 = arith.constant 1.000000e-24 : f32
    %18 = vector.broadcast %cst_12 : f32 to vector<8x1xf32>
    %19 = arith.maximumf %17, %18 : vector<8x1xf32>
    %20 = math.rsqrt %19 : vector<8x1xf32>
    %21 = vector.broadcast %20 : vector<8x1xf32> to vector<8x128xf32>
    %22 = arith.mulf %14, %21 : vector<8x128xf32>
    %23 = vector.extract_strided_slice %22 {offsets = [0, 0], sizes = [8, 9], strides = [1, 1]} : vector<8x128xf32> to vector<8x9xf32>
    %c0_13 = arith.constant 0 : index
    %c0_14 = arith.constant 0 : index
    %24 = vector.load %arg6[%c0_13, %c0_14] : memref<8x9xf32, #tpu.memory_space<vmem>>, vector<8x9xf32>
    tpu.vector_store %arg6[%c0_13, %c0_14], %23 {strides = array<i32>} : memref<8x9xf32, #tpu.memory_space<vmem>>, vector<8x9xf32>,
    return
  }
  func.func @transform_0(%arg0: i32) -> (i32, i32) {
    %c0_i32 = arith.constant 0 : i32
    %c0_i32_0 = arith.constant 0 : i32
    return %arg0, %c0_i32 : i32, i32
  }
  func.func @transform_1(%arg0: i32) -> (i32, i32) {
    %c0_i32 = arith.constant 0 : i32
    %c0_i32_0 = arith.constant 0 : i32
    %c0_i32_1 = arith.constant 0 : i32
    return %c0_i32, %c0_i32_0 : i32, i32
  }
  func.func @transform_2(%arg0: i32) -> (i32, i32) {
    %c0_i32 = arith.constant 0 : i32
    %c0_i32_0 = arith.constant 0 : i32
    %c0_i32_1 = arith.constant 0 : i32
    return %c0_i32, %c0_i32_0 : i32, i32
  }
  func.func @transform_3(%arg0: i32) -> (i32, i32) {
    %c0_i32 = arith.constant 0 : i32
    %c0_i32_0 = arith.constant 0 : i32
    %c0_i32_1 = arith.constant 0 : i32
    return %c0_i32, %c0_i32_0 : i32, i32
  }
  func.func @transform_4(%arg0: i32) -> (i32, i32) {
    %c0_i32 = arith.constant 0 : i32
    %c0_i32_0 = arith.constant 0 : i32
    %c0_i32_1 = arith.constant 0 : i32
    return %c0_i32, %c0_i32_0 : i32, i32
  }
  func.func @transform_5(%arg0: i32) -> (i32, i32) {
    %c0_i32 = arith.constant 0 : i32
    %c0_i32_0 = arith.constant 0 : i32
    return %arg0, %c0_i32 : i32, i32
  }
}

</mosaic_0001>

<bundles_post_ra>
// kernel: tpu_custom_call.1
= control target key start
LH: loop header
LB: loop body
LE: loop exit
PB: predicated region body
PF: predicated region fallthrough
CT: control target
= control target key end

     0   :  { %10 = vsyncpa [#allocation3], 0  ;;  %s1685_s0 = inlined_call_operand.hbm [shape: f32[16,768], index: 0, kind: input, shape index: {}]   ;;  %s1686_s1 = inlined_call_operand.hbm [shape: bf16[768,128], index: 1, kind: input, shape index: {}]   ;;  %s1687_s2 = inlined_call_operand.vmem [shape: f32[1,128], index: 2, kind: input, shape index: {}]   ;;  %s1688_s3 = inlined_call_operand.hbm [shape: bf16[128,128], index: 3, kind: input, shape index: {}]   ;;  %s1689_s4 = inlined_call_operand.vmem [shape: f32[1,128], index: 4, kind: input, shape index: {}]   ;;  %s1690_s5 = inlined_call_operand.hbm [shape: f32[16,9], index: 5, kind: output, shape index: {}]  }
   0x1   :  { %12 = vsyncpa [#allocation3 + $0x1], 0 }
   0x2   :  { %13 = vsyncpa [#allocation6], 0 }
   0x3   :  { %14 = vsyncpa [#allocation4], 0 }
   0x4   :  { %16 = vsyncpa [#allocation4 + $0x1], 0  ;;  %s1505_s18 = smov 0   ;;  %s1507_s19 = smov 0  }
   0x5   :  { %s1509_s20 = smov 0   ;;  %s1511_s21 = smov 0  }
   0x6 LB: > { %s1526_s22 = sadd.s32 4294967295, %s1465_s21   ;;  %s1018_s23 = sadd.s32 4294967294, %s1465_s21   ;;  %s1465_s21 = sphi %s1511_s21, %s1712_s21   ;;  %s1461_s20 = sphi %s1509_s20, %s1711_s20   ;;  %s1457_s19 = sphi %s1507_s19, %s1710_s19   ;;  %s1453_s18 = sphi %s1505_s18, %s1709_s18  }
   0x7   : > { %p42_p0 = scmp.ne.s32.totalorder %s1457_s19, %s1453_s18  ;;  %p1691_p1 = scmp.eq.s32.totalorder %s1526_s22, 0 }
   0x8   : > { %p156_p3 = scmp.eq.s32.totalorder %s1018_s23, 1  ;;  %p1019_p5 = scmp.ge.s32.totalorder %s1465_s21, 1 }
   0x9   : > { %p1535_p4 = por %p1691_p1, %p42_p0  ;;  %p163_p7 = scmp.lt.s32.totalorder %s1465_s21, 3 }
   0xa   : > { %p1540_p6 = por %p156_p3, %p42_p0  ;;  %s1467_s27 = smov [#allocation5]  }
   0xb   : > { %s1695_s24 = scalar_select %p1535_p4, 1, 0 }
   0xc   : > { %s1696_s25 = scalar_select %p1540_p6, 1, 0 }
   0xd   : > { %p1545_p8 = pnand %p1019_p5, %p163_p7  ;;  %s175_s28 = sshll.u32 %s1467_s27, 4  ;;  %s176_s28 = int_to_ptr.vmem [resolvable:$true] %s175_s28 }
   0xe   : > { %s1468_s30 = smov [#allocation7]   ;;  %s1328_s7 = scalar_lea.vmem %s176_s28, 6144 }
   0xf   : > { %s1697_s26 = scalar_select %p1545_p8, 1, 0 }
  0x10   : > { %p1200_p9 = pneg %p1545_p8  ;;  %s191_s6 = sshll.u32 %s1468_s30, 4  ;;  %s192_s6 = int_to_ptr.vmem [resolvable:$true] %s191_s6 }
  0x11   : > { %p1329_p13 = scmp.ne.s32.totalorder %s176_s28, %s1328_s7  ;;  %p1336_p5 = scmp.lt.s32.totalorder %s176_s28, %s176_s28 }
  0x12   : > { %p1554_p11 = pnand %p1200_p9, %p1691_p1  ;;  %p1337_p7 = scmp.lt.s32.totalorder %s1328_s7, %s1328_s7 }
  0x14   : > { %p1319_p12 = pneg %p1554_p11  ;;  %p1338_p10 = por %p1337_p7, %p1336_p5 }
  0x16   : > { %p1331_p0 = pnand %p1329_p13, %p1319_p12 }
  0x18   : > { %p1332_p3 = pneg %p1331_p0 }
  0x1a   : > { %p1339_p9 = pnand %p1338_p10, %p1332_p3 }
  0x1c   : > { %1342 = shalt.err (!%p1339_p9)
}
  0x1d   : > { %s1469_s8 = smov 64   ;;  %s1470_s9 = smov 4  }
  0x1e   : > { %1203 = dma.hbm_to_vmem [thread:$0]  (!%p1554_p11), %s1686_s1, 6144, %s176_s28, [#allocation6], %s1469_s8, %s1469_s8, %s1470_s9  }
  0x1f   : > { %s1354_s12 = scalar_lea.vmem %s192_s6, 1024  ;;  %p1362_p2 = scmp.lt.s32.totalorder %s192_s6, %s192_s6 }
  0x20   : > { %p1355_p1 = scmp.ne.s32.totalorder %s192_s6, %s1354_s12  ;;  %p1363_p6 = scmp.lt.s32.totalorder %s1354_s12, %s1354_s12 }
  0x22   : > { %p1357_p13 = pnand %p1355_p1, %p1319_p12  ;;  %p1364_p5 = por %p1363_p6, %p1362_p2 }
  0x24   : > { %p1358_p0 = pneg %p1357_p13 }
  0x26   : > { %p1365_p10 = pnand %p1364_p5, %p1358_p0 }
  0x28   : > { %1368 = shalt.err (!%p1365_p10)
}
  0x29   : > { %1206 = dma.hbm_to_vmem [thread:$0]  (!%p1554_p11), %s1688_s3, 1024, %s192_s6, [#allocation6], %s1469_s8, %s1469_s8, %s1470_s9  }
  0x2a   : > { %s1577_s15 = sadd.s32 1, %s1465_s21   ;;  %s29_s16 = sadd.s32 1, %s1461_s20 }
  0x2b   : > { %s26_s17 = ssub.s32 %s1465_s21, %s1577_s15  ;;  %p36_p1 = scmp.ne.s32.totalorder %s1461_s20, %s1457_s19 }
  0x2c   : > { %p27_p2 = scmp.eq.s32.totalorder %s26_s17, 0  ;;  %p37_p6 = scmp.eq.s32.totalorder %s1465_s21, 0 }
  0x2d   : > { %p1699_p12 = scmp.eq.s32.totalorder %s1526_s22, 1  ;;  %p1217_p7 = scmp.lt.s32.totalorder %s1465_s21, 2 }
  0x2e   : > { %s1593_s27 = scalar_select %p27_p2, %s1461_s20, %s29_s16  }
  0x2f   : > { %p1587_p3 = por %p1699_p12, %p36_p1  ;;  %p38_p9 = por %p37_p6, %p36_p1 }
  0x30   : > { %s208_s28 = sand.u32 1, %s1461_s20   ;;  %s1186_s30 = smul.u32 768, %s1465_s21 }
  0x31   : > { %s1700_s23 = scalar_select %p1587_p3, 1, 0 }
  0x32   : > { %s1185_s29 = smul.u32 48, %s208_s28  ;;  %p1597_p11 = pnand %p1217_p7, %p38_p9 }
  0x33   : > { %s1604_s9 = scalar_lea.hbm %s1685_s0, %s1186_s30  ;;  %s209_s12 = scalar_lea.sflag [#allocation3], %s208_s28 }
  0x34   : > { %s212_s10 = scalar_lea.vmem [#allocation2], %s1185_s29  ;;  %s1369_s13 = scalar_lea.hbm %s1604_s9, 768 }
  0x35   : > { %s220_s11 = sshll.u32 %s212_s10, 4  ;;  %p1370_p13 = scmp.ne.s32.totalorder %s1604_s9, %s1369_s13  ;;  %s221_s11 = int_to_ptr.vmem [resolvable:$true] %s220_s11 }
  0x36   : > { %p1371_p0 = pneg %p1597_p11  ;;  %s1374_s17 = scalar_lea.hbm %s1685_s0, 1536 }
  0x37   : > { %p1375_p1 = scmp.lt.s32.totalorder %s1604_s9, %s1685_s0  ;;  %p1376_p2 = scmp.lt.s32.totalorder %s1374_s17, %s1369_s13 }
  0x38   : > { %p1372_p5 = pnand %p1371_p0, %p1370_p13 }
  0x39   : > { %p1377_p6 = por %p1376_p2, %p1375_p1 }
  0x3a   : > { %p1373_p10 = pneg %p1372_p5 }
  0x3c   : > { %p1378_p12 = pnand %p1377_p6, %p1373_p10 }
  0x3e   : > { %1381 = shalt.err (!%p1378_p12)
}
  0x3f   : > { %s1382_s29 = scalar_lea.vmem %s221_s11, 768  ;;  %s1471_s28 = smov [#allocation2]  }
  0x40   : > { %p1383_p7 = scmp.ne.s32.totalorder %s221_s11, %s1382_s29  ;;  %s1387_s8 = sshll.u32 %s1471_s28, 4  ;;  %s1388_s8 = int_to_ptr.vmem [resolvable:$false] %s1387_s8 }
  0x41   : > { %s1389_s10 = scalar_lea.vmem %s1388_s8, 1536  ;;  %p1390_p13 = scmp.lt.s32.totalorder %s221_s11, %s1388_s8 }
  0x42   : > { %p1385_p9 = pnand %p1383_p7, %p1371_p0  ;;  %p1391_p5 = scmp.lt.s32.totalorder %s1389_s10, %s1382_s29 }
  0x44   : > { %p1386_p3 = pneg %p1385_p9  ;;  %p1392_p4 = por %p1391_p5, %p1390_p13 }
  0x46   : > { %p1393_p8 = pnand %p1392_p4, %p1386_p3 }
  0x48   : > { %1396 = shalt.err (!%p1393_p8)
}
  0x49   : > { %1210 = dma.hbm_to_vmem [thread:$0]  (!%p1597_p11), %s1604_s9, 768, %s221_s11, %s209_s12  }
  0x4a   : > { %p1702_p10 = scmp.ne.s32.totalorder %s1697_s26, 0 }
  0x4b   : > { %s1623_s13 = sand.u32 (!%p1702_p10), 1, %s1457_s19   ;;  %p1703_p0 = scmp.ne.s32.totalorder (!%p1702_p10), %s1695_s24, 0 }
  0x4c   : > { %229 = sbr.rel (%p1702_p10) target bundleno = 719 (0x2cf), region = 40  ;;  %s232_s16 = scalar_lea.sflag (!%p1702_p10), [#allocation3], %s1623_s13 }
  0x4d   : > { %s1187_s14 = smul.u32 (!%p1702_p10), 48, %s1623_s13 }
  0x4f   : > { %s1627_s17 = scalar_lea.vmem (!%p1702_p10), [#allocation2], %s1187_s14 }
  0x51   : > { %1440 = dma.done.wait (%p1703_p0), %s232_s16, 768  }
  0x52   : > { %1442 = vsyncadd (%p1703_p0), %s232_s16, 4294966528  ;;  %p1704_p4 = scmp.eq.s32.totalorder %s1526_s22, 0 }
  0x54   : > { %1444 = dma.done.wait (%p1704_p4), [#allocation6], 7168   ;;  %p1705_p8 = pmov %p1704_p4 }
  0x55   : > { %v1259_v0 = vld [vmem:[#allocation5 + $0x78] sm:$0xff]   ;;  %v1263_v4 = vld [vmem:[#allocation5 + $0x70] sm:$0xff]   ;;  %v1267_v8 = vld [vmem:[#allocation5 + $0x68] sm:$0xff]   ;;  %v1472_v61 = vmov 0.0   ;;  %vm1473_vm0 = vmmov 0   ;;  %s1027_s11 = sshll.u32 %s1623_s13, 3 }
  0x56   : > { %1446 = vsyncadd (%p1705_p8), [#allocation6], 4294960128  ;;  %v1260_v1 = vld [vmem:[#allocation5 + $0x38] sm:$0xff]   ;;  %1090 = vmatprep.subr.bf16.mxu0 %v1259_v0  ;;  %v1264_v5 = vld [vmem:[#allocation5 + $0x30] sm:$0xff]   ;;  %s1087_s12 = sshll.u32 %s1526_s22, 7  ;;  %s269_s7 = scalar_lea.vmem [#allocation8], %s1027_s11 }
  0x57   : > { %v1261_v2 = vld [vmem:[#allocation5 + $0xf8] sm:$0xff]   ;;  %1091 = vmatpush3.bf16.msra.mxu0 %v1260_v1  ;;  %v1265_v6 = vld [vmem:[#allocation5 + $0xf0] sm:$0xff]   ;;  %v1268_v9 = vld [vmem:[#allocation5 + $0x28] sm:$0xff]   ;;  %s929_s30 = sshll.u32 %s269_s7, 4  ;;  %vm913_vm1 = vcmask 72704   ;;  %s927_s8 = scalar_lea.hbm %s1690_s5, %s1087_s12  ;;  %s930_s30 = int_to_ptr.vmem [resolvable:$true] %s929_s30 }
  0x58   : > { %v1262_v3 = vld [vmem:[#allocation5 + $0xb8] sm:$0xff]   ;;  %1112 = vmatprep.subr.bf16.mxu1 %v1261_v2  ;;  %1092 = vmatprep.subr.bf16.mxu0 %v1263_v4  ;;  %v1266_v7 = vld [vmem:[#allocation5 + $0xb0] sm:$0xff]   ;;  %v1269_v10 = vld [vmem:[#allocation5 + $0xe8] sm:$0xff]   ;;  %s916_s10 = scalar_lea.sflag [#allocation4], %s1623_s13  ;;  %s1397_s14 = scalar_lea.vmem %s930_s30, 128 }
  0x59   : > { %1113 = vmatpush3.bf16.msra.mxu1 %v1262_v3  ;;  %v1270_v11 = vld [vmem:[#allocation5 + $0xa8] sm:$0xff]   ;;  %v1271_v12 = vld [vmem:[#allocation5 + $0x60] sm:$0xff]   ;;  %v1275_v16 = vld [vmem:[#allocation5 + $0x58] sm:$0xff]   ;;  %p1398_p3 = scmp.ne.s32.totalorder %s930_s30, %s1397_s14  ;;  %p1706_p11 = scmp.ne.s32.totalorder %s1700_s23, 0 }
  0x5a   : > { %1114 = vmatprep.subr.bf16.mxu1 %v1265_v6  ;;  %v1272_v13 = vld [vmem:[#allocation5 + $0x20] sm:$0xff]   ;;  %v1276_v17 = vld [vmem:[#allocation5 + $0x18] sm:$0xff]   ;;  %v1279_v20 = vld [vmem:[#allocation5 + $0x50] sm:$0xff]   ;;  %s1474_s16 = smov [#allocation8]  }
  0x5b   : > { %1093 = vmatpush3.bf16.msra.mxu0 %v1264_v5  ;;  %v1273_v14 = vld [vmem:[#allocation5 + $0xe0] sm:$0xff]   ;;  %v1277_v18 = vld [vmem:[#allocation5 + $0xd8] sm:$0xff]   ;;  %v1280_v21 = vld [vmem:[#allocation5 + $0x10] sm:$0xff]   ;;  %p1399_p1 = pnand %p1398_p3, %p1706_p11 }
  0x5c   : > { %1094 = vmatprep.subr.bf16.mxu0 %v1267_v8  ;;  %v1274_v15 = vld [vmem:[#allocation5 + $0xa0] sm:$0xff]   ;;  %v1278_v19 = vld [vmem:[#allocation5 + $0x98] sm:$0xff]   ;;  %v1281_v22 = vld [vmem:[#allocation5 + $0xd0] sm:$0xff]  }
  0x5d   : > { %1115 = vmatpush3.bf16.msra.mxu1 %v1266_v7  ;;  %v1282_v23 = vld [vmem:[#allocation5 + $0x90] sm:$0xff]   ;;  %v1283_v24 = vld [vmem:[#allocation5 + $0x48] sm:$0xff]   ;;  %v1287_v28 = vld [vmem:[#allocation5 + $0x40] sm:$0xff]   ;;  %p1400_p2 = pneg %p1399_p1 }
  0x5e   : > { %1116 = vmatprep.subr.bf16.mxu1 %v1269_v10  ;;  %v1284_v25 = vld [vmem:[#allocation5 + $0x8] sm:$0xff]   ;;  %v1288_v29 = vld [vmem:[#allocation5] sm:$0xff]   ;;  %v1291_v36 = vld [vmem:[#allocation5 + $0x178] sm:$0xff]  }
  0x5f   : > { %1095 = vmatpush3.bf16.msra.mxu0 %v1268_v9  ;;  %v1285_v26 = vld [vmem:[#allocation5 + $0xc8] sm:$0xff]   ;;  %v1289_v30 = vld [vmem:[#allocation5 + $0xc0] sm:$0xff]   ;;  %v1292_v39 = vld [vmem:[#allocation5 + $0x138] sm:$0xff]  }
  0x60   : > { %1096 = vmatprep.subr.bf16.mxu0 %v1271_v12  ;;  %v1286_v27 = vld [vmem:[#allocation5 + $0x88] sm:$0xff]   ;;  %v1290_v33 = vld [vmem:[#allocation5 + $0x80] sm:$0xff]   ;;  %v1293_v42 = vld [vmem:[#allocation5 + $0x170] sm:$0xff]  }
  0x61   : > { %1117 = vmatpush3.bf16.msra.mxu1 %v1270_v11  ;;  %v272_v31 = vld [vmem:[%s1627_s17 + $0x8] sm:$0xff]  ;;  %v271_v34 = vld [vmem:[%s1627_s17] sm:$0xff]  ;;  %v274_v37 = vld [vmem:[%s1627_s17 + $0x18] sm:$0xff] }
  0x62   : > { %1118 = vmatprep.subr.bf16.mxu1 %v1273_v14  ;;  %v278_v32 = vpack.c.bf16 %v272_v31, %v272_v31  ;;  %v277_v35 = vpack.c.bf16 %v271_v34, %v271_v34  ;;  %v280_v38 = vpack.c.bf16 %v274_v37, %v274_v37  ;;  %v273_v40 = vld [vmem:[%s1627_s17 + $0x10] sm:$0xff]  ;;  %v1295_v44 = vld [vmem:[#allocation5 + $0x168] sm:$0xff]   ;;  %v1299_v48 = vld [vmem:[#allocation5 + $0x158] sm:$0xff]  }
  0x63   : > { %1097 = vmatpush3.bf16.msra.mxu0 %v1272_v13  ;;  %v279_v41 = vpack.c.bf16 %v273_v40, %v273_v40  ;;  %v1294_v43 = vld [vmem:[#allocation5 + $0x130] sm:$0xff]   ;;  %v1296_v45 = vld [vmem:[#allocation5 + $0x128] sm:$0xff]   ;;  %v1297_v46 = vld [vmem:[#allocation5 + $0x160] sm:$0xff]  }
  0x64   : > { %1098 = vmatprep.subr.bf16.mxu0 %v1275_v16  ;;  %706 = vmatprep.mubr.bf16.mxu0 %v278_v32  ;;  %v1298_v47 = vld [vmem:[#allocation5 + $0x120] sm:$0xff]   ;;  %v1300_v49 = vld [vmem:[#allocation5 + $0x118] sm:$0xff]   ;;  %v1301_v50 = vld [vmem:[#allocation5 + $0x150] sm:$0xff]  }
  0x65   : > { %1119 = vmatpush3.bf16.msra.mxu1 %v1274_v15  ;;  %746 = vmatprep.mubr.bf16.mxu1 %v280_v38  ;;  %v276_v51 = vld [vmem:[%s1627_s17 + $0x28] sm:$0xff]  ;;  %v1302_v52 = vld [vmem:[#allocation5 + $0x110] sm:$0xff]   ;;  %v1305_v56 = vld [vmem:[#allocation5 + $0x140] sm:$0xff]  }
  0x66   : > { %1120 = vmatprep.subr.bf16.mxu1 %v1277_v18  ;;  %v282_v53 = vpack.c.bf16 %v276_v51, %v276_v51  ;;  %v1303_v54 = vld [vmem:[#allocation5 + $0x148] sm:$0xff]   ;;  %v1306_v57 = vld [vmem:[#allocation5 + $0x100] sm:$0xff]   ;;  %v1307_v60 = vld [vmem:[#allocation7 + $0x38] sm:$0xff]  }
  0x67   : > { %1099 = vmatpush3.bf16.msra.mxu0 %v1276_v17  ;;  %v1304_v55 = vld [vmem:[#allocation5 + $0x108] sm:$0xff]   ;;  %v275_v58 = vld [vmem:[%s1627_s17 + $0x20] sm:$0xff]  ;;  %v1311_v1 = vld [vmem:[#allocation7 + $0x18] sm:$0xff]   ;;  %s1401_s17 = sshll.u32 %s1474_s16, 4  ;;  %s1402_s17 = int_to_ptr.vmem [resolvable:$false] %s1401_s17 }
  0x68   : > { %1100 = vmatprep.subr.bf16.mxu0 %v1279_v20  ;;  %v281_v59 = vpack.c.bf16 %v275_v58, %v275_v58  ;;  %v1308_v62 = vld [vmem:[#allocation7 + $0x30] sm:$0xff]   ;;  %v1309_v63 = vld [vmem:[#allocation7 + $0x28] sm:$0xff]   ;;  %v1310_v0 = vld [vmem:[#allocation7 + $0x20] sm:$0xff]   ;;  %s1403_s22 = scalar_lea.vmem %s1402_s17, 256  ;;  %p1404_p6 = scmp.lt.s32.totalorder %s930_s30, %s1402_s17 }
  0x69   : > { %1121 = vmatpush3.bf16.msra.mxu1 %v1278_v19  ;;  %v1312_v2 = vld [vmem:[#allocation7 + $0x10] sm:$0xff]   ;;  %v1313_v3 = vld [vmem:[#allocation7 + $0x8] sm:$0xff]   ;;  %v1314_v4 = vld [vmem:[#allocation7] sm:$0xff]   ;;  %p1405_p12 = scmp.lt.s32.totalorder %s1403_s22, %s1397_s14 }
  0x6a   : > { %1122 = vmatprep.subr.bf16.mxu1 %v1281_v22  ;;  %v1028_v14 = vld [vmem:[%s1687_s2] ss:$0 sm:$0xff] }
  0x6b   : > { %1101 = vmatpush3.bf16.msra.mxu0 %v1280_v21  ;;  %p1406_p7 = por %p1405_p12, %p1404_p6 }
  0x6c   : > { %1102 = vmatprep.subr.bf16.mxu0 %v1283_v24 }
  0x6d   : > { %1123 = vmatpush3.bf16.msra.mxu1 %v1282_v23  ;;  %p1407_p9 = pnand %p1406_p7, %p1400_p2 }
  0x6e   : > { %1124 = vmatprep.subr.bf16.mxu1 %v1285_v26  ;;  %v1077_v26 = vld [vmem:[%s1689_s4] ss:$0 sm:$0xff] }
  0x6f   : > { %1103 = vmatpush3.bf16.msra.mxu0 %v1284_v25 }
  0x70   : > { %1104 = vmatprep.subr.bf16.mxu0 %v1287_v28 }
  0x71   : > { %1125 = vmatpush3.bf16.msra.mxu1 %v1286_v27 }
  0x72   : > { %1126 = vmatprep.subr.bf16.mxu1 %v1289_v30 }
  0x73   : > { %1105 = vmatpush3.bf16.msra.mxu0 %v1288_v29 }
  0x74   : > { %1134 = vmatprep.subr.bf16.mxu0 %v1291_v36 }
  0x75   : > { %1127 = vmatpush3.bf16.msra.mxu1 %v1290_v33 }
  0x76   : > { %707 = vmatmul.mubr.bf16.vlgmr.msra.gmra.mxu0 %v277_v35  ;;  %1165 = vmatprep.subr.bf16.mxu1 %v1472_v61 }
  0x77   : > { %1135 = vmatpush3.bf16.msra.mxu0 %v1292_v39  ;;  %786 = vmatprep.mubr.bf16.mxu0 %v282_v53 }
  0x78   : > { %747 = vmatmul.mubr.bf16.vlgmr.msra.gmra.mxu1 %v279_v41  ;;  %1136 = vmatprep.subr.bf16.mxu0 %v1293_v42 }
  0x79   : > { %1166 = vmatpush3.bf16.msra.mxu1 %v1307_v60  ;;  %1181 = vmatprep.mubr.msk.bf16.mxu1 %vm1473_vm0, %v1472_v61 }
  0x7a   : > { %1167 = vmatprep.subr.bf16.mxu1 %v1472_v61 }
  0x7b   : > { %1137 = vmatpush3.bf16.msra.mxu0 %v1294_v43 }
  0x7c   : > { %1138 = vmatprep.subr.bf16.mxu0 %v1295_v44 }
  0x7d   : > { %1168 = vmatpush3.bf16.msra.mxu1 %v1308_v62 }
  0x7e   : > { %1169 = vmatprep.subr.bf16.mxu1 %v1472_v61 }
  0x7f   : > { %1139 = vmatpush3.bf16.msra.mxu0 %v1296_v45 }
  0x80   : > { %1140 = vmatprep.subr.bf16.mxu0 %v1297_v46 }
  0x81   : > { %1170 = vmatpush3.bf16.msra.mxu1 %v1309_v63 }
  0x82   : > { %1171 = vmatprep.subr.bf16.mxu1 %v1472_v61 }
  0x83   : > { %1141 = vmatpush3.bf16.msra.mxu0 %v1298_v47 }
  0x84   : > { %1142 = vmatprep.subr.bf16.mxu0 %v1299_v48 }
  0x85   : > { %1172 = vmatpush3.bf16.msra.mxu1 %v1310_v0 }
  0x86   : > { %1173 = vmatprep.subr.bf16.mxu1 %v1472_v61 }
  0x87   : > { %1143 = vmatpush3.bf16.msra.mxu0 %v1300_v49 }
  0x88   : > { %1144 = vmatprep.subr.bf16.mxu0 %v1301_v50 }
  0x89   : > { %1174 = vmatpush3.bf16.msra.mxu1 %v1311_v1 }
  0x8a   : > { %1175 = vmatprep.subr.bf16.mxu1 %v1472_v61 }
  0x8b   : > { %1145 = vmatpush3.bf16.msra.mxu0 %v1302_v52 }
  0x8c   : > { %1146 = vmatprep.subr.bf16.mxu0 %v1303_v54 }
  0x8d   : > { %1176 = vmatpush3.bf16.msra.mxu1 %v1312_v2 }
  0x8e   : > { %1177 = vmatprep.subr.bf16.mxu1 %v1472_v61 }
  0x8f   : > { %1147 = vmatpush3.bf16.msra.mxu0 %v1304_v55 }
  0x90   : > { %1148 = vmatprep.subr.bf16.mxu0 %v1305_v56 }
  0x91   : > { %1178 = vmatpush3.bf16.msra.mxu1 %v1313_v3 }
  0x92   : > { %1179 = vmatprep.subr.bf16.mxu1 %v1472_v61 }
  0x93   : > { %1149 = vmatpush3.bf16.msra.mxu0 %v1306_v57 }
  0x95   : > { %1180 = vmatpush3.bf16.msra.mxu1 %v1314_v4 }
  0x96   : > { %787 = vmatmul.mubr.bf16.vlgmr.msra.gmra.mxu0 %v281_v59 }
 0x136   : > { %v1106_v5 = vpop.f32.mrf.mxu0 }
 0x138   : > { %v1107_v6 = vpop.f32.mrf.mxu0  ;;  %v1128_v7 = vpop.f32.mrf.mxu1 }
 0x139   : > { %v1108_v13 = vadd.f32 %v1107_v6, %v1106_v5 }
 0x13a   : > { %v1109_v8 = vpop.f32.mrf.mxu0  ;;  %v1129_v9 = vpop.f32.mrf.mxu1 }
 0x13b   : > { %v709_v15 = vadd.f32 %v1108_v13, %v1028_v14  ;;  %v1130_v16 = vadd.f32 %v1129_v9, %v1128_v7 }
 0x13c   : > { %v1110_v10 = vpop.f32.mrf.mxu0  ;;  %v1131_v11 = vpop.f32.mrf.mxu1 }
 0x13d   : > { %v749_v19 = vadd.f32 %v1130_v16, %v709_v15 }
 0x13e   : > { %v1132_v12 = vpop.f32.mrf.mxu1 }
 0x156   : > { %v1150_v17 = vpop.f32.mrf.mxu0 }
 0x158   : > { %v1151_v18 = vpop.f32.mrf.mxu0 }
 0x159   : > { %v1152_v20 = vadd.f32 %v1151_v18, %v1150_v17 }
 0x15a   : > { %v1153_v21 = vpop.f32.mrf.mxu0 }
 0x15b   : > { %v789_v22 = vadd.f32 %v1152_v20, %v749_v19 }
 0x15c   : > { %v1154_v23 = vpop.f32.mrf.mxu0 }
 0x15d   : > { %v794_v24 = vmax.f32 %v789_v22, 0.0 }
 0x15f   : > { %v795_v25 = vpack.c.bf16 %v794_v24, %v794_v24 }
 0x161   : > { %1182 = vmatmul.mubr.bf16.vlgmr.msra.gmra.mxu1 %v795_v25 }
 0x221   : > { %v901_v27 = vpop.f32.mrf.mxu1 }
 0x222   : > { %v902_v28 = vadd.f32 %v1077_v26, %v901_v27 }
 0x223   : > { %v1183_v29 = vpop.f32.mrf.mxu1 }
 0x224   : > { %v907_v30 = vmul.f32 %v902_v28, %v902_v28 }
 0x225   : > { %v904_v31 = vpop.f32.mrf.mxu1 }
 0x226   : > { %908 = vadd.xlane.f32.xlu0 %v907_v30 }
 0x227   : > { %v1184_v32 = vpop.f32.mrf.mxu1 }
 0x2af   : > { %v909_v33 = vpop.xlane.xlu0 %908 }
 0x2b0   : > { %v910_v34 = vmax.f32 %v909_v33, 1e-24 }
 0x2b2   : > { %1315 = vrsqrt.f32 %v910_v34 }
 0x2bf   : > { %v1316_v35 = vpop.eup %1315 }
 0x2c0   : > { %v912_v36 = vmul.f32 %v1316_v35, %v902_v28 }
 0x2c2   : > { %914 = vst.msk [vmem:[%s269_s7] sm:$0xff] %vm913_vm1, %v912_v36 }
 0x2c3   : > { %1410 = shalt.err (!%p1407_p9)
}
 0x2c4   : > { %s1411_s24 = scalar_lea.hbm %s927_s8, 128  ;;  %s1415_s6 = scalar_lea.hbm %s1690_s5, 256 }
 0x2c5   : > { %p1412_p13 = scmp.ne.s32.totalorder %s927_s8, %s1411_s24  ;;  %p1416_p0 = scmp.lt.s32.totalorder %s927_s8, %s1690_s5 }
 0x2c6   : > { %p1417_p4 = scmp.lt.s32.totalorder %s1415_s6, %s1411_s24 }
 0x2c7   : > { %p1413_p5 = pnand %p1412_p13, %p1706_p11 }
 0x2c8   : > { %p1418_p8 = por %p1417_p4, %p1416_p0 }
 0x2c9   : > { %p1414_p10 = pneg %p1413_p5 }
 0x2cb   : > { %p1419_p3 = pnand %p1418_p8, %p1414_p10 }
 0x2cd   : > { %1422 = shalt.err (!%p1419_p3)
}
 0x2ce   : > { %1198 = dma.vmem_to_hbm [thread:$0]  (%p1706_p11), %s930_s30, 128, %s927_s8, %s916_s10  }
 0x2cf PF: > { %s941_s12 = sand.u32 1, %s1453_s18   ;;  %p1707_p1 = scmp.ne.s32.totalorder %s1696_s25, 0 }
 0x2d0   : > { %p1708_p2 = scmp.ge.s32.totalorder %s1465_s21, 2  ;;  %s942_s7 = scalar_lea.sflag [#allocation4], %s941_s12 }
 0x2d2   : > { %p1212_p6 = pnand %p1708_p2, %p1707_p1 }
 0x2d4   : > { %p1213_p12 = pneg %p1212_p6 }
 0x2d6   : > { %1448 = dma.done.wait (%p1213_p12), %s942_s7, 128  }
 0x2d7   : > { %1450 = vsyncadd (%p1213_p12), %s942_s7, 4294967168  ;;  %p19_p7 = scmp.ge.s32.totalorder %s1577_s15, 4   ;;  %s1709_s18 = smov %s1457_s19 }
 0x2d8   : > { %s1710_s19 = smov %s1461_s20  ;;  %s1711_s20 = smov %s1593_s27 }
 0x2d9   : > { %s1712_s21 = smov %s1577_s15  ;;  %21 = sbr.rel (!%p19_p7) target bundleno = 6 (0x6), region = 93 }
 0x2de   :  { %947 = vsyncpa [#allocation3], 1 }
 0x2df   :  { %949 = vsyncpa [#allocation3 + $0x1], 1 }
 0x2e0   :  { %950 = vsyncpa [#allocation6], 1 }
 0x2e1   :  { %951 = vsyncpa [#allocation4], 1 }
 0x2e2   :  { %953 = vsyncpa [#allocation4 + $0x1], 1 }

</bundles_post_ra>
